<compile_context>
chip_gen: v7x
topology: tpu7x:2x2x1
jax: 0.10.0
libtpu: 0.0.40
codegen_flags: <defaults>
</compile_context>

<pallas_src>
import functools

import jax
import jax.numpy as jnp
from jax.experimental import pallas as pl
from jax.experimental.pallas import tpu as pltpu


def _round_up(n, m):
    return (n + m - 1) // m * m


def conv_bn_kernel(w_ref, b_ref, x_ref, o_ref, *, kh, kw, wp, l_tile, halo_pad):
    # w_ref: (cout_p, kh*kw*cin_p)  tap-stacked BN-folded weights (resident).
    # b_ref: (cout_p, 1)            folded conv-bias + BN shift (f32, resident).
    # x_ref: (1, cin_p, L_in)       zero-padded flattened image (resident per n).
    # o_ref: (1, cout_p, l_tile)    lane-dense output tile.
    t = pl.program_id(1)
    base = pl.multiple_of(t * l_tile, 128)
    win = l_tile + halo_pad

    # Ref-sliced window load: only this tile + its conv halo enters vregs.
    window = x_ref[0, :, pl.ds(base, win)]                    # (cin_p, win)

    # Fused im2col: one wide slice per kernel row, kw narrow shifts from it,
    # stacked along sublanes -> single MXU contraction with K = kh*kw*cin_p.
    taps = []
    for dh in range(kh):
        row = window[:, dh * wp: dh * wp + l_tile + (kw - 1)]
        for dw in range(kw):
            taps.append(row[:, dw: dw + l_tile])              # (cin_p, l_tile)
    xs = jnp.concatenate(taps, axis=0) if len(taps) > 1 else taps[0]

    acc = jnp.dot(w_ref[...], xs, preferred_element_type=jnp.float32)
    o_ref[0, :, :] = (acc + b_ref[...]).astype(o_ref.dtype)


def cnn_layer_forward(x, conv_w, conv_b, bn_gamma, bn_beta, bn_mean, bn_var,
                      eps=1e-5, lane_tile=1024, compute_dtype=jnp.bfloat16):
    """Conv2d(SAME) + BatchNorm2d(eval, running stats) + Dropout(eval=identity)."""
    N, Cin, H, W = x.shape
    Cout, _, kh, kw = conv_w.shape
    assert kh % 2 == 1 and kw % 2 == 1
    ph, pw = (kh - 1) // 2, (kw - 1) // 2
    Hp, Wp = H + 2 * ph, W + 2 * pw

    # --- fold BatchNorm (inference / running stats) into weights + bias ---
    scale = bn_gamma / jnp.sqrt(bn_var + eps)                   # (Cout,)
    w_fold = conv_w * scale[:, None, None, None]                # (Cout,Cin,kh,kw)
    bias = scale * (conv_b - bn_mean) + bn_beta                 # (Cout,)

    # Channel padding to a sublane multiple (bf16 packs 2 rows/sublane -> 16)
    # so in-kernel sublane concat / slices stay tile-aligned.
    sub = 8 * (4 // jnp.dtype(compute_dtype).itemsize)
    cin_p = _round_up(Cin, sub)
    cout_p = _round_up(Cout, 8)

    # Tap-stacked weights (cout_p, kh*kw*cin_p): K index = (dh*kw+dw)*cin_p + ci.
    w_r = jnp.transpose(w_fold, (2, 3, 1, 0))                   # (kh,kw,Cin,Cout)
    w_r = jnp.pad(w_r, ((0, 0), (0, 0), (0, cin_p - Cin), (0, cout_p - Cout)))
    w_2d = w_r.reshape(kh * kw * cin_p, cout_p).T.astype(compute_dtype)
    bias_p = jnp.pad(bias, (0, cout_p - Cout)).reshape(cout_p, 1).astype(jnp.float32)

    # --- lane tiling over the flattened per-image output grid (H x Wp) ---
    L_need = H * Wp
    l_tile = min(lane_tile, _round_up(L_need, 128))
    num_tiles = pl.cdiv(L_need, l_tile)
    if (N * num_tiles) % 2:              # keep both v7x TensorCores busy
        alt = _round_up(pl.cdiv(L_need, num_tiles + 1), 128)
        if alt < l_tile:
            l_tile = alt
            num_tiles = pl.cdiv(L_need, l_tile)
    L_out = num_tiles * l_tile
    halo = (kh - 1) * Wp + (kw - 1)
    halo_pad = _round_up(halo, 128)
    L_in = L_out + halo_pad              # >= Hp*Wp + kw - 1, so all taps in bounds

    # --- per-image flattened input: pad + reshape only, no HBM transpose ---
    x_pad = jnp.pad(x, ((0, 0), (0, cin_p - Cin), (ph, ph), (pw, pw)))
    x_flat = x_pad.reshape(N, cin_p, Hp * Wp)
    x_flat = jnp.pad(x_flat, ((0, 0), (0, 0), (0, L_in - Hp * Wp)))
    x_flat = x_flat.astype(compute_dtype)

    kernel = functools.partial(conv_bn_kernel, kh=kh, kw=kw, wp=Wp,
                               l_tile=l_tile, halo_pad=halo_pad)

    out_flat = pl.pallas_call(
        kernel,
        out_shape=jax.ShapeDtypeStruct((N, cout_p, L_out), x.dtype),
        grid=(N, num_tiles),
        in_specs=[
            # Constant-index operands: single-buffered (no refetch, less VMEM).
            pl.BlockSpec((cout_p, kh * kw * cin_p), lambda n, t: (0, 0),
                         pipeline_mode=pl.Buffered(1)),
            pl.BlockSpec((cout_p, 1), lambda n, t: (0, 0),
                         pipeline_mode=pl.Buffered(1)),
            # Per-image slab: resident across the tile axis, double-buffered
            # across the batch axis (prefetches image n+1 under compute).
            pl.BlockSpec((1, cin_p, L_in), lambda n, t: (n, 0, 0)),
        ],
        out_specs=pl.BlockSpec((1, cout_p, l_tile), lambda n, t: (n, 0, t)),
        compiler_params=pltpu.CompilerParams(
            dimension_semantics=("parallel", "parallel"),
            vmem_limit_bytes=32 * 1024 * 1024),
    )(w_2d, bias_p, x_flat)

    # Discard padded channels / out-of-image lanes; no output transpose needed.
    out = out_flat[:, :Cout, :H * Wp].reshape(N, Cout, H, Wp)[:, :, :, :W]
    # nn.Dropout is identity in eval mode; BatchNorm uses running stats.
    # TODO(synk): train-mode dropout masking and batch-statistics BatchNorm not implemented.
    # TODO(synk): for very large H*W per image, halo-tile the input via manual DMA
    # (memory_space=pl.ANY + pltpu.make_async_copy) instead of per-image residency.
    return out


if __name__ == "__main__":
    key = jax.random.PRNGKey(0)
    N, Cin, Cout, H, W = 2, 4, 8, 16, 16
    kh, kw = 3, 3
    k1, k2, k3, k4, k5 = jax.random.split(key, 5)

    x = jax.random.normal(k1, (N, Cin, H, W), dtype=jnp.float32)
    conv_w = 0.1 * jax.random.normal(k2, (Cout, Cin, kh, kw), dtype=jnp.float32)
    conv_b = 0.1 * jax.random.normal(k3, (Cout,), dtype=jnp.float32)
    bn_gamma = 1.0 + 0.1 * jax.random.normal(k4, (Cout,), dtype=jnp.float32)
    bn_beta = 0.1 * jax.random.normal(k5, (Cout,), dtype=jnp.float32)
    bn_mean = jnp.zeros((Cout,), dtype=jnp.float32)   # BatchNorm2d running_mean init
    bn_var = jnp.ones((Cout,), dtype=jnp.float32)     # BatchNorm2d running_var init

    fwd = jax.jit(cnn_layer_forward)
    out = jax.block_until_ready(
        fwd(x, conv_w, conv_b, bn_gamma, bn_beta, bn_mean, bn_var))

    # Pure-JAX f32 reference (conv + bias + eval-mode BN).
    ref_conv = jax.lax.conv_general_dilated(
        x, conv_w, window_strides=(1, 1), padding="SAME",
        dimension_numbers=("NCHW", "OIHW", "NCHW")) + conv_b.reshape(1, Cout, 1, 1)
    ref_scale = bn_gamma / jnp.sqrt(bn_var + 1e-5)
    ref = (ref_scale.reshape(1, Cout, 1, 1)
           * (ref_conv - bn_mean.reshape(1, Cout, 1, 1))
           + bn_beta.reshape(1, Cout, 1, 1))

    assert out.shape == (N, Cout, H, W)
    # bf16 inputs with f32 accumulation -> bf16-level tolerance vs f32 reference.
    assert jnp.allclose(out, ref, atol=2e-2, rtol=2e-2)

    print("KERNEL_OK")
</pallas_src>

<mosaic_0001>
module attributes {stable_mosaic.version = 11 : i64} {
  func.func @conv_bn_kernel(%arg0: i32, %arg1: i32, %arg2: memref<8x144xbf16, #tpu.memory_space<vmem>>, %arg3: memref<8x1xf32, #tpu.memory_space<vmem>>, %arg4: memref<1x16x512xbf16, #tpu.memory_space<vmem>>, %arg5: memref<1x8x384xf32, #tpu.memory_space<vmem>>) attributes {dimension_semantics = [#tpu.dimension_semantics<parallel>, #tpu.dimension_semantics<parallel>], iteration_bounds = array<i64: 2, 1>, scalar_prefetch = 0 : i64, scratch_operands = 0 : i64, tpu.core_type = #tpu.core_type<tc>, window_params = [{pipeline_mode = #tpu.pipeline_mode<synchronous>, transform_indices = @transform_0, window_bounds = array<i64: 8, 144>}, {pipeline_mode = #tpu.pipeline_mode<synchronous>, transform_indices = @transform_1, window_bounds = array<i64: 8, 1>}, {transform_indices = @transform_2, window_bounds = array<i64: 1, 16, 512>}, {transform_indices = @transform_3, window_bounds = array<i64: 1, 8, 384>}]} {
    %c384_i32 = arith.constant 384 : i32
    %0 = arith.muli %arg1, %c384_i32 : i32
    %1 = tpu.assume_multiple %0, 128 : i32
    %c0 = arith.constant 0 : index
    %c0_0 = arith.constant 0 : index
    %2 = arith.index_cast %1 : i32 to index
    %3 = vector.load %arg4[%c0, %c0_0, %2] : memref<1x16x512xbf16, #tpu.memory_space<vmem>>, vector<1x16x512xbf16>
    %4 = vector.shape_cast %3 : vector<1x16x512xbf16> to vector<16x512xbf16>
    %5 = vector.extract_strided_slice %4 {offsets = [0, 0], sizes = [16, 386], strides = [1, 1]} : vector<16x512xbf16> to vector<16x386xbf16>
    %6 = vector.extract_strided_slice %5 {offsets = [0, 0], sizes = [16, 384], strides = [1, 1]} : vector<16x386xbf16> to vector<16x384xbf16>
    %7 = vector.extract_strided_slice %5 {offsets = [0, 1], sizes = [16, 384], strides = [1, 1]} : vector<16x386xbf16> to vector<16x384xbf16>
    %8 = vector.extract_strided_slice %5 {offsets = [0, 2], sizes = [16, 384], strides = [1, 1]} : vector<16x386xbf16> to vector<16x384xbf16>
    %9 = vector.extract_strided_slice %4 {offsets = [0, 18], sizes = [16, 386], strides = [1, 1]} : vector<16x512xbf16> to vector<16x386xbf16>
    %10 = vector.extract_strided_slice %9 {offsets = [0, 0], sizes = [16, 384], strides = [1, 1]} : vector<16x386xbf16> to vector<16x384xbf16>
    %11 = vector.extract_strided_slice %9 {offsets = [0, 1], sizes = [16, 384], strides = [1, 1]} : vector<16x386xbf16> to vector<16x384xbf16>
    %12 = vector.extract_strided_slice %9 {offsets = [0, 2], sizes = [16, 384], strides = [1, 1]} : vector<16x386xbf16> to vector<16x384xbf16>
    %13 = vector.extract_strided_slice %4 {offsets = [0, 36], sizes = [16, 386], strides = [1, 1]} : vector<16x512xbf16> to vector<16x386xbf16>
    %14 = vector.extract_strided_slice %13 {offsets = [0, 0], sizes = [16, 384], strides = [1, 1]} : vector<16x386xbf16> to vector<16x384xbf16>
    %15 = vector.extract_strided_slice %13 {offsets = [0, 1], sizes = [16, 384], strides = [1, 1]} : vector<16x386xbf16> to vector<16x384xbf16>
    %16 = vector.extract_strided_slice %13 {offsets = [0, 2], sizes = [16, 384], strides = [1, 1]} : vector<16x386xbf16> to vector<16x384xbf16>
    %17 = tpu.concatenate %6, %7, %8, %10, %11, %12, %14, %15, %16 in 0 : vector<16x384xbf16>, vector<16x384xbf16>, vector<16x384xbf16>, vector<16x384xbf16>, vector<16x384xbf16>, vector<16x384xbf16>, vector<16x384xbf16>, vector<16x384xbf16>, vector<16x384xbf16> -> vector<144x384xbf16>
    %c0_1 = arith.constant 0 : index
    %c0_2 = arith.constant 0 : index
    %18 = vector.load %arg2[%c0_1, %c0_2] : memref<8x144xbf16, #tpu.memory_space<vmem>>, vector<8x144xbf16>
    %cst = arith.constant dense<0.000000e+00> : vector<8x384xf32>
    %19 = tpu.matmul %18, %17, %cst {dimension_numbers = #tpu.dot_dimension_numbers<[1], [0], [0], [1], [0, 0, 1, 1], [], []>} : vector<8x144xbf16>, vector<144x384xbf16>, vector<8x384xf32> -> vector<8x384xf32>
    %c0_3 = arith.constant 0 : index
    %c0_4 = arith.constant 0 : index
    %20 = vector.load %arg3[%c0_3, %c0_4] : memref<8x1xf32, #tpu.memory_space<vmem>>, vector<8x1xf32>
    %21 = vector.broadcast %20 : vector<8x1xf32> to vector<8x384xf32>
    %22 = arith.addf %19, %21 : vector<8x384xf32>
    %c0_5 = arith.constant 0 : index
    %c0_6 = arith.constant 0 : index
    %c0_7 = arith.constant 0 : index
    %23 = vector.load %arg5[%c0_5, %c0_6, %c0_7] : memref<1x8x384xf32, #tpu.memory_space<vmem>>, vector<1x8x384xf32>
    %24 = vector.shape_cast %23 : vector<1x8x384xf32> to vector<8x384xf32>
    %25 = vector.shape_cast %22 : vector<8x384xf32> to vector<1x8x384xf32>
    tpu.vector_store %arg5[%c0_5, %c0_6, %c0_7], %25 {strides = array<i32>} : memref<1x8x384xf32, #tpu.memory_space<vmem>>, vector<1x8x384xf32>,
    return
  }
  func.func @transform_0(%arg0: i32, %arg1: i32) -> (i32, i32) {
    %c0_i32 = arith.constant 0 : i32
    %c0_i32_0 = arith.constant 0 : i32
    %c0_i32_1 = arith.constant 0 : i32
    return %c0_i32, %c0_i32_0 : i32, i32
  }
  func.func @transform_1(%arg0: i32, %arg1: i32) -> (i32, i32) {
    %c0_i32 = arith.constant 0 : i32
    %c0_i32_0 = arith.constant 0 : i32
    %c0_i32_1 = arith.constant 0 : i32
    return %c0_i32, %c0_i32_0 : i32, i32
  }
  func.func @transform_2(%arg0: i32, %arg1: i32) -> (i32, i32, i32) {
    %c0_i32 = arith.constant 0 : i32
    %c0_i32_0 = arith.constant 0 : i32
    %c0_i32_1 = arith.constant 0 : i32
    return %arg0, %c0_i32, %c0_i32_0 : i32, i32, i32
  }
  func.func @transform_3(%arg0: i32, %arg1: i32) -> (i32, i32, i32) {
    %c0_i32 = arith.constant 0 : i32
    %c0_i32_0 = arith.constant 0 : i32
    return %arg0, %c0_i32, %arg1 : i32, i32, i32
  }
}

</mosaic_0001>

<bundles_post_ra>
// kernel: cnn_layer_forward.1
= control target key start
LH: loop header
LB: loop body
LE: loop exit
PB: predicated region body
PF: predicated region fallthrough
CT: control target
= control target key end

     0   :  { %s642_s12 = smov 0   ;;  %s644_s13 = smov 0   ;;  %s701_s0 = inlined_call_operand.vmem [shape: bf16[8,144], index: 0, kind: input, shape index: {}]   ;;  %s702_s1 = inlined_call_operand.vmem [shape: f32[8,1], index: 1, kind: input, shape index: {}]   ;;  %s703_s2 = inlined_call_operand.vmem [shape: bf16[2,16,512], index: 2, kind: input, shape index: {}]   ;;  %s704_s3 = inlined_call_operand.vmem [shape: f32[2,8,384], index: 3, kind: output, shape index: {}]  }
   0x1   :  { %s646_s14 = smov 0  }
   0x2 LB: > { %s25_s15 = sadd.s32 1, %s607_s13  ;;  %p531_p0 = scmp.ge.s32.totalorder %s611_s14, 1  ;;  %s611_s14 = sphi %s646_s14, %s13_s14   ;;  %s607_s13 = sphi %s644_s13, %s706_s13   ;;  %s603_s12 = sphi %s642_s12, %s705_s12  }
   0x3   : > { %p27_p1 = scmp.ge.s32.totalorder %s25_s15, 2  ;;  %p151_p2 = scmp.lt.s32.totalorder %s611_s14, 3 }
   0x5   : > { %s708_s15 = smov (%p27_p1, %s25_s15), 0  ;;  %p152_p3 = pnand %p531_p0, %p151_p2 }
   0x6   : > { %p179_p4 = scmp.lt.s32.totalorder (!%p152_p3), %s603_s12, 1  ;;  %v613_v0 = vmov (!%p152_p3), 0   ;;  %s614_s20 = smov (!%p152_p3), 127   ;;  %v672_v5 = vld [vmem:[%s701_s0] sm:$0xff] (!%p152_p3)  ;;  %vm356_vm0 = vcmask (!%p152_p3), 130048   ;;  %vm231_vm1 = vcmask (!%p152_p3), 1039360  }
   0x7   : > { %155 = sbr.rel (%p152_p3) target bundleno = 413 (0x19d), region = 32  ;;  %401 = vmatprep.subr.bf16.mxu1 (!%p152_p3), %v613_v0  ;;  %580 = vset.pattern.permute.xlu0 (!%p152_p3), %v613_v0  ;;  %s615_s21 = smov (!%p152_p3), 126   ;;  %v540_v6 = vcombine.high (!%p152_p3), %v672_v5, %v672_v5  ;;  %v344_v7 = vld [vmem:[%s702_s1] sm:$0xff] (!%p152_p3)  ;;  %vm246_vm2 = vcmask (!%p152_p3), 1031168   ;;  %vm261_vm3 = vcmask (!%p152_p3), 900096   ;;  %vm276_vm4 = vcmask (!%p152_p3), 891904  }
   0x8   : > { %s616_s22 = smov (!%p152_p3), 110   ;;  %s617_s23 = smov (!%p152_p3), 109   ;;  %vm291_vm5 = vcmask (!%p152_p3), 883712   ;;  %vm306_vm6 = vcmask (!%p152_p3), 752640   ;;  %vm321_vm7 = vcmask (!%p152_p3), 744448   ;;  %vm336_vm8 = vcmask (!%p152_p3), 736256  }
   0x9   : > { %s618_s24 = smov (!%p152_p3), 108   ;;  %s619_s25 = smov (!%p152_p3), 92   ;;  %541 = vmatprep.mubr.msk.bf16.mxu0 (!%p152_p3), %vm356_vm0, %v540_v6  ;;  %542 = vmatprep.mubr.msk.bf16.mxu1 (!%p152_p3), %vm356_vm0, %v540_v6  ;;  %v539_v63 = vcombine.low (!%p152_p3), %v672_v5, %v672_v5 }
   0xa   : > { %s620_s26 = smov (!%p152_p3), 91   ;;  %s621_s29 = smov (!%p152_p3), 90  }
   0xe   : > { %s710_s12 = smov (!%p179_p4, %s603_s12), 1 }
   0xf   : > { %s545_s16 = sshll.u32 %s710_s12, 5  ;;  %s546_s5 = smul.u32 24, %s710_s12 }
  0x10   : > { %s183_s19 = scalar_lea.vmem %s703_s2, %s545_s16 }
  0x11   : > { %v581_v1 = vld [vmem:[%s183_s19 + $0x4] ss:$16 sps:$4 sm:$0xff]   ;;  %v583_v2 = vld [vmem:[%s183_s19] ss:$16 sps:$4 sm:$0xff]   ;;  %v584_v3 = vld [vmem:[%s183_s19 + $0x8] ss:$16 sps:$4 sm:$0xff]   ;;  %s192_s8 = scalar_lea.vmem %s704_s3, %s546_s5 }
  0x12   : > { %225 = vrot.lane.b32.xlu0 %v581_v1, %s614_s20  ;;  %360 = vmatprep.subr.bf16.mxu0 %v581_v1  ;;  %v586_v4 = vld [vmem:[%s183_s19 + $0xc] ss:$16 sps:$4 sm:$0xff]  }
  0x13   : > { %223 = vrot.lane.b32.xlu1 %v583_v2, %s614_s20  ;;  %361 = vmatpush1.bf16.msra.mxu0 %v583_v2 }
  0x14   : > { %402 = vmatpush1.bf16.msra.mxu1 %v584_v3 }
  0x15   : > { %403 = vmatprep.subr.bf16.mxu1 %v613_v0 }
  0x16   : > { %227 = vrot.lane.b32.xlu0 %v584_v3, %s614_s20 }
  0x17   : > { %229 = vrot.lane.b32.xlu1 %v586_v4, %s614_s20 }
  0x1a   : > { %240 = vrot.lane.b32.xlu0 %v581_v1, %s615_s21 }
  0x1b   : > { %242 = vrot.lane.b32.xlu1 %v584_v3, %s615_s21 }
  0x1e   : > { %238 = vrot.lane.b32.xlu0 %v583_v2, %s615_s21 }
  0x1f   : > { %244 = vrot.lane.b32.xlu1 %v586_v4, %s615_s21 }
  0x22   : > { %255 = vrot.lane.b32.xlu0 %v581_v1, %s616_s22 }
  0x23   : > { %257 = vrot.lane.b32.xlu1 %v584_v3, %s616_s22 }
  0x26   : > { %253 = vrot.lane.b32.xlu0 %v583_v2, %s616_s22 }
  0x27   : > { %259 = vrot.lane.b32.xlu1 %v586_v4, %s616_s22 }
  0x2a   : > { %270 = vrot.lane.b32.xlu0 %v581_v1, %s617_s23 }
  0x2b   : > { %272 = vrot.lane.b32.xlu1 %v584_v3, %s617_s23 }
  0x2e   : > { %268 = vrot.lane.b32.xlu0 %v583_v2, %s617_s23 }
  0x2f   : > { %274 = vrot.lane.b32.xlu1 %v586_v4, %s617_s23 }
  0x32   : > { %285 = vrot.lane.b32.xlu0 %v581_v1, %s618_s24 }
  0x33   : > { %287 = vrot.lane.b32.xlu1 %v584_v3, %s618_s24 }
  0x36   : > { %283 = vrot.lane.b32.xlu0 %v583_v2, %s618_s24 }
  0x37   : > { %289 = vrot.lane.b32.xlu1 %v586_v4, %s618_s24 }
  0x3a   : > { %300 = vrot.lane.b32.xlu0 %v581_v1, %s619_s25 }
  0x3b   : > { %302 = vrot.lane.b32.xlu1 %v584_v3, %s619_s25 }
  0x3e   : > { %298 = vrot.lane.b32.xlu0 %v583_v2, %s619_s25 }
  0x3f   : > { %304 = vrot.lane.b32.xlu1 %v586_v4, %s619_s25 }
  0x42   : > { %315 = vrot.lane.b32.xlu0 %v581_v1, %s620_s26 }
  0x43   : > { %317 = vrot.lane.b32.xlu1 %v584_v3, %s620_s26 }
  0x46   : > { %313 = vrot.lane.b32.xlu0 %v583_v2, %s620_s26 }
  0x47   : > { %319 = vrot.lane.b32.xlu1 %v586_v4, %s620_s26 }
  0x4a   : > { %330 = vrot.lane.b32.xlu0 %v581_v1, %s621_s29 }
  0x4b   : > { %332 = vrot.lane.b32.xlu1 %v584_v3, %s621_s29 }
  0x4e   : > { %328 = vrot.lane.b32.xlu0 %v583_v2, %s621_s29 }
  0x4f   : > { %334 = vrot.lane.b32.xlu1 %v586_v4, %s621_s29 }
  0x52   : > { %347 = vperm.xlu0 %580, %v344_v7  }
  0x84   : > { %v226_v8 = vpop.permute.xlu0 %225 }
  0x85   : > { %v224_v9 = vpop.permute.xlu1 %223 }
  0x86   : > { %v232_v14 = vsel %vm231_vm1, %v224_v9, %v226_v8 }
  0x88   : > { %v228_v10 = vpop.permute.xlu0 %227 }
  0x89   : > { %v230_v11 = vpop.permute.xlu1 %229  ;;  %v233_v12 = vsel %vm231_vm1, %v226_v8, %v228_v10 }
  0x8a   : > { %362 = vmatprep.subr.bf16.mxu0 %v233_v12  ;;  %v234_v13 = vsel %vm231_vm1, %v228_v10, %v230_v11 }
  0x8b   : > { %404 = vmatpush1.bf16.msra.mxu1 %v234_v13  ;;  %363 = vmatpush1.bf16.msra.mxu0 %v232_v14 }
  0x8c   : > { %v241_v15 = vpop.permute.xlu0 %240  ;;  %405 = vmatprep.subr.bf16.mxu1 %v613_v0 }
  0x8d   : > { %v243_v16 = vpop.permute.xlu1 %242 }
  0x8e   : > { %v248_v17 = vsel %vm246_vm2, %v241_v15, %v243_v16 }
  0x8f   : > { %364 = vmatprep.subr.bf16.mxu0 %v248_v17 }
  0x90   : > { %v239_v18 = vpop.permute.xlu0 %238 }
  0x91   : > { %v245_v19 = vpop.permute.xlu1 %244  ;;  %v247_v20 = vsel %vm246_vm2, %v239_v18, %v241_v15 }
  0x92   : > { %365 = vmatpush1.bf16.msra.mxu0 %v247_v20  ;;  %v249_v21 = vsel %vm246_vm2, %v243_v16, %v245_v19 }
  0x93   : > { %406 = vmatpush1.bf16.msra.mxu1 %v249_v21 }
  0x94   : > { %v256_v22 = vpop.permute.xlu0 %255  ;;  %407 = vmatprep.subr.bf16.mxu1 %v613_v0 }
  0x95   : > { %v258_v23 = vpop.permute.xlu1 %257 }
  0x96   : > { %v263_v24 = vsel %vm261_vm3, %v256_v22, %v258_v23 }
  0x97   : > { %366 = vmatprep.subr.bf16.mxu0 %v263_v24 }
  0x98   : > { %v254_v25 = vpop.permute.xlu0 %253 }
  0x99   : > { %v260_v26 = vpop.permute.xlu1 %259  ;;  %v262_v27 = vsel %vm261_vm3, %v254_v25, %v256_v22 }
  0x9a   : > { %367 = vmatpush1.bf16.msra.mxu0 %v262_v27  ;;  %v264_v28 = vsel %vm261_vm3, %v258_v23, %v260_v26 }
  0x9b   : > { %408 = vmatpush1.bf16.msra.mxu1 %v264_v28 }
  0x9c   : > { %v271_v29 = vpop.permute.xlu0 %270  ;;  %409 = vmatprep.subr.bf16.mxu1 %v613_v0 }
  0x9d   : > { %v273_v30 = vpop.permute.xlu1 %272 }
  0x9e   : > { %v278_v31 = vsel %vm276_vm4, %v271_v29, %v273_v30 }
  0x9f   : > { %368 = vmatprep.subr.bf16.mxu0 %v278_v31 }
  0xa0   : > { %v269_v32 = vpop.permute.xlu0 %268 }
  0xa1   : > { %v275_v33 = vpop.permute.xlu1 %274  ;;  %v277_v34 = vsel %vm276_vm4, %v269_v32, %v271_v29 }
  0xa2   : > { %369 = vmatpush1.bf16.msra.mxu0 %v277_v34  ;;  %v279_v35 = vsel %vm276_vm4, %v273_v30, %v275_v33 }
  0xa3   : > { %410 = vmatpush1.bf16.msra.mxu1 %v279_v35 }
  0xa4   : > { %v286_v36 = vpop.permute.xlu0 %285  ;;  %411 = vmatprep.subr.bf16.mxu1 %v613_v0 }
  0xa5   : > { %v288_v37 = vpop.permute.xlu1 %287 }
  0xa6   : > { %v293_v38 = vsel %vm291_vm5, %v286_v36, %v288_v37 }
  0xa7   : > { %370 = vmatprep.subr.bf16.mxu0 %v293_v38 }
  0xa8   : > { %v284_v39 = vpop.permute.xlu0 %283 }
  0xa9   : > { %v290_v40 = vpop.permute.xlu1 %289  ;;  %v292_v41 = vsel %vm291_vm5, %v284_v39, %v286_v36 }
  0xaa   : > { %371 = vmatpush1.bf16.msra.mxu0 %v292_v41  ;;  %v294_v42 = vsel %vm291_vm5, %v288_v37, %v290_v40 }
  0xab   : > { %412 = vmatpush1.bf16.msra.mxu1 %v294_v42 }
  0xac   : > { %v301_v43 = vpop.permute.xlu0 %300  ;;  %413 = vmatprep.subr.bf16.mxu1 %v613_v0 }
  0xad   : > { %v303_v44 = vpop.permute.xlu1 %302 }
  0xae   : > { %v308_v45 = vsel %vm306_vm6, %v301_v43, %v303_v44 }
  0xaf   : > { %372 = vmatprep.subr.bf16.mxu0 %v308_v45 }
  0xb0   : > { %v299_v46 = vpop.permute.xlu0 %298 }
  0xb1   : > { %v305_v47 = vpop.permute.xlu1 %304  ;;  %v307_v48 = vsel %vm306_vm6, %v299_v46, %v301_v43 }
  0xb2   : > { %373 = vmatpush1.bf16.msra.mxu0 %v307_v48  ;;  %v309_v49 = vsel %vm306_vm6, %v303_v44, %v305_v47 }
  0xb3   : > { %414 = vmatpush1.bf16.msra.mxu1 %v309_v49 }
  0xb4   : > { %v316_v50 = vpop.permute.xlu0 %315  ;;  %415 = vmatprep.subr.bf16.mxu1 %v613_v0 }
  0xb5   : > { %v318_v51 = vpop.permute.xlu1 %317 }
  0xb6   : > { %v323_v52 = vsel %vm321_vm7, %v316_v50, %v318_v51 }
  0xb7   : > { %374 = vmatprep.subr.bf16.mxu0 %v323_v52 }
  0xb8   : > { %v314_v53 = vpop.permute.xlu0 %313 }
  0xb9   : > { %v320_v54 = vpop.permute.xlu1 %319  ;;  %v322_v55 = vsel %vm321_vm7, %v314_v53, %v316_v50 }
  0xba   : > { %375 = vmatpush1.bf16.msra.mxu0 %v322_v55  ;;  %v324_v56 = vsel %vm321_vm7, %v318_v51, %v320_v54 }
  0xbb   : > { %416 = vmatpush1.bf16.msra.mxu1 %v324_v56 }
  0xbc   : > { %v331_v57 = vpop.permute.xlu0 %330  ;;  %417 = vmatprep.subr.bf16.mxu1 %v613_v0 }
  0xbd   : > { %v333_v58 = vpop.permute.xlu1 %332 }
  0xbe   : > { %v338_v59 = vsel %vm336_vm8, %v331_v57, %v333_v58 }
  0xbf   : > { %376 = vmatprep.subr.bf16.mxu0 %v338_v59 }
  0xc0   : > { %v329_v60 = vpop.permute.xlu0 %328 }
  0xc1   : > { %v335_v61 = vpop.permute.xlu1 %334  ;;  %v337_v62 = vsel %vm336_vm8, %v329_v60, %v331_v57 }
  0xc2   : > { %377 = vmatpush1.bf16.msra.mxu0 %v337_v62  ;;  %v339_v1 = vsel %vm336_vm8, %v333_v58, %v335_v61 }
  0xc3   : > { %418 = vmatpush1.bf16.msra.mxu1 %v339_v1 }
  0xc5   : > { %393 = vmatmul.mubr.bf16.vlgmr.msra.gmra.mrb[0].mxu0 %v539_v63 }
  0xc6   : > { %434 = vmatmul.mubr.bf16.vlgmr.msra.gmra.mrb[0].mxu1 %v539_v63 }
  0xd1   : > { %v348_v2 = vpop.permute.xlu0 %347 }
 0x198   : > { %v394_v0 = vpop.f32.mrb[0].mxu0 }
 0x199   : > { %v395_v3 = vadd.f32 %v394_v0, %v348_v2  ;;  %v435_v4 = vpop.f32.mrb[0].mxu1  ;;  %v396_v6 = vpop.f32.mrb[1].mxu0 }
 0x19a   : > { %v436_v7 = vadd.f32 %v435_v4, %v348_v2  ;;  %v397_v8 = vadd.f32 %v396_v6, %v348_v2  ;;  %v437_v9 = vpop.f32.mrb[1].mxu1  ;;  %v398_v10 = vpop.f32.mrb[2].mxu0 }
 0x19b   : > { %441 = vst [vmem:[%s192_s8] sm:$0xff] %v395_v3  ;;  %v438_v5 = vpop.f32.mrb[2].mxu1  ;;  %v399_v11 = vpop.f32.mrb[3].mxu0 }
 0x19c   : > { %443 = vst [vmem:[%s192_s8 + $0x10] sm:$0xff] %v436_v7  ;;  %442 = vst [vmem:[%s192_s8 + $0x8] sm:$0xff] %v397_v8  ;;  %v439_v12 = vpop.f32.mrb[3].mxu1 }
 0x19d PF: > { %s13_s14 = sadd.s32 1, %s611_s14   ;;  %s705_s12 = smov %s607_s13 }
 0x19e   : > { %p10_p5 = scmp.ge.s32.totalorder %s13_s14, 4   ;;  %s706_s13 = smov %s708_s15 }
 0x1a0   :  { %12 = sbr.rel (!%p10_p5) target bundleno = 2 (0x2), region = 63 }

</bundles_post_ra>
